<compile_context>
chip_gen: v6e
topology: v6e:2x2x1
jax: 0.10.0
libtpu: 0.0.40
codegen_flags: <defaults>
</compile_context>

<pallas_src>
import jax
import jax.numpy as jnp
from jax.experimental import pallas as pl
from jax.experimental.pallas import tpu as pltpu

LOG_SIG_MIN = -20.0
LOG_SIG_MAX = 1.0

# Rows per grid step.  At 2048 rows the in-kernel f32 temps (h1, h2) plus the
# double-buffered narrow I/O tiles total a few MiB -> fits the default scoped
# VMEM on v5e (16 MiB) as well as v6e / v7x (32 MiB), so no vmem_limit_bytes
# override is needed.
MAX_TILE_B = 2048
# Above this batch size, keep >=2 roughly equal blocks so v7x's two
# TensorCores are both used ("parallel" grid axis); below it a single block
# wins (per-step overhead dominates the tiny compute).
SPLIT_THRESHOLD = 512


def _round_up(x, m):
    return ((x + m - 1) // m) * m


def _pick_tile_b(batch):
    if batch <= SPLIT_THRESHOLD:
        return batch                       # single block (full-dim block is legal)
    half = _round_up(pl.cdiv(batch, 2), 8)  # >=2 blocks, sublane-aligned
    return min(MAX_TILE_B, half)


def gaussian_policy_kernel(x_ref, w1_ref, b1_ref, w2_ref, b2_ref,
                           wm_ref, bm_ref, ws_ref, bs_ref,
                           mean_ref, log_std_ref):
    # State arrives as f32 (narrow HBM read); cast to bf16 in-kernel.
    x = x_ref[...].astype(jnp.bfloat16)

    # layer 1: bf16 MXU matmul, f32 accumulation; bias add + relu in f32.
    h1 = jnp.dot(x, w1_ref[...], preferred_element_type=jnp.float32)
    h1 = jnp.maximum(h1 + b1_ref[...], 0.0)

    # layer 2
    h2 = jnp.dot(h1.astype(jnp.bfloat16), w2_ref[...],
                 preferred_element_type=jnp.float32)
    h2 = jnp.maximum(h2 + b2_ref[...], 0.0)
    h2b = h2.astype(jnp.bfloat16)

    # Heads: two tiny-N matmuls written straight to the two narrow outputs
    # (no padded 128-lane slab, no wrapper slicing, 16 B/row HBM writeback).
    mean = jnp.dot(h2b, wm_ref[...], preferred_element_type=jnp.float32)
    mean = mean + bm_ref[...]

    log_std = jnp.dot(h2b, ws_ref[...], preferred_element_type=jnp.float32)
    log_std = jnp.clip(log_std + bs_ref[...], LOG_SIG_MIN, LOG_SIG_MAX)

    mean_ref[...] = mean.astype(mean_ref.dtype)
    log_std_ref[...] = log_std.astype(log_std_ref.dtype)


def pack_params(params):
    """Pad hidden to a 128-lane multiple and quantize weights (not biases) to
    bf16.  Zero padding is exact: padded h1/h2 columns are relu(0) = 0 and the
    corresponding padded weight rows are 0, so results are unchanged."""
    w1, b1, w2, b2, wm, bm, ws, bs = params
    hidden = w1.shape[1]
    hpad = _round_up(hidden, 128)

    def pad_to(a, rows, cols):
        return jnp.pad(a, ((0, rows - a.shape[0]), (0, cols - a.shape[1])))

    w1p = pad_to(w1, w1.shape[0], hpad).astype(jnp.bfloat16)   # (in,   HPAD) bf16
    b1p = pad_to(b1, 1, hpad)                                  # (1,    HPAD) f32
    w2p = pad_to(w2, hpad, hpad).astype(jnp.bfloat16)          # (HPAD, HPAD) bf16
    b2p = pad_to(b2, 1, hpad)                                  # (1,    HPAD) f32
    wmp = pad_to(wm, hpad, wm.shape[1]).astype(jnp.bfloat16)   # (HPAD, A)    bf16
    wsp = pad_to(ws, hpad, ws.shape[1]).astype(jnp.bfloat16)   # (HPAD, A)    bf16
    return (w1p, b1p, w2p, b2p, wmp, bm, wsp, bs)


def gaussian_policy_forward(state, packed):
    """Fused forward pass.  state: (B, num_inputs) f32.
    Returns (mean, log_std), each (B, num_actions) f32."""
    w1, b1, w2, b2, wm, bm, ws, bs = packed
    B, num_inputs = state.shape
    hpad = w1.shape[1]
    num_actions = wm.shape[1]

    tile_b = _pick_tile_b(B)
    grid = (pl.cdiv(B, tile_b),)

    flops = 2 * B * (num_inputs * hpad + hpad * hpad + 2 * hpad * num_actions)
    bytes_accessed = (state.size * 4
                      + sum(int(p.size) * p.dtype.itemsize for p in packed)
                      + 2 * B * num_actions * 4)

    def resident(shape):
        return pl.BlockSpec(shape, lambda i: (0, 0))

    mean, log_std = pl.pallas_call(
        gaussian_policy_kernel,
        out_shape=(jax.ShapeDtypeStruct((B, num_actions), jnp.float32),
                   jax.ShapeDtypeStruct((B, num_actions), jnp.float32)),
        grid=grid,
        in_specs=[
            pl.BlockSpec((tile_b, num_inputs), lambda i: (i, 0)),  # batch-tiled state
            resident(w1.shape), resident(b1.shape),                # resident weights
            resident(w2.shape), resident(b2.shape),
            resident(wm.shape), resident(bm.shape),
            resident(ws.shape), resident(bs.shape),
        ],
        out_specs=(pl.BlockSpec((tile_b, num_actions), lambda i: (i, 0)),
                   pl.BlockSpec((tile_b, num_actions), lambda i: (i, 0))),
        compiler_params=pltpu.CompilerParams(
            dimension_semantics=("parallel",)),
        cost_estimate=pl.CostEstimate(flops=flops, transcendentals=0,
                                      bytes_accessed=bytes_accessed),
    )(state, w1, b1, w2, b2, wm, bm, ws, bs)
    return mean, log_std


def xavier_uniform(key, fan_in, fan_out):
    # Matches torch.nn.init.xavier_uniform_ (gain=1): U(-a, a), a = sqrt(6/(fan_in+fan_out))
    a = jnp.sqrt(6.0 / (fan_in + fan_out))
    return jax.random.uniform(key, (fan_in, fan_out), jnp.float32, -a, a)


def init_params(key, num_inputs, hidden_dim, num_actions):
    ks = jax.random.split(key, 8)
    w1 = xavier_uniform(ks[0], num_inputs, hidden_dim)
    b1 = jax.random.uniform(ks[1], (1, hidden_dim), jnp.float32, -0.1, 0.1)
    w2 = xavier_uniform(ks[2], hidden_dim, hidden_dim)
    b2 = jax.random.uniform(ks[3], (1, hidden_dim), jnp.float32, -0.1, 0.1)
    wm = xavier_uniform(ks[4], hidden_dim, num_actions)
    bm = jax.random.uniform(ks[5], (1, num_actions), jnp.float32, -0.1, 0.1)
    ws = xavier_uniform(ks[6], hidden_dim, num_actions)
    bs = jax.random.uniform(ks[7], (1, num_actions), jnp.float32, -0.1, 0.1)
    return (w1, b1, w2, b2, wm, bm, ws, bs)


def reference_forward(state, params):
    # Mirrors the kernel's bf16 quantization of matmul operands (f32 accumulate)
    # so the check isolates accumulation-order differences only.
    def q(a):
        return a.astype(jnp.bfloat16).astype(jnp.float32)

    w1, b1, w2, b2, wm, bm, ws, bs = params
    hp = jax.lax.Precision.HIGHEST
    x = q(state)
    h1 = jnp.maximum(jnp.dot(x, q(w1), precision=hp) + b1, 0.0)
    h2 = jnp.maximum(jnp.dot(q(h1), q(w2), precision=hp) + b2, 0.0)
    mean = jnp.dot(q(h2), q(wm), precision=hp) + bm
    log_std = jnp.clip(jnp.dot(q(h2), q(ws), precision=hp) + bs,
                       LOG_SIG_MIN, LOG_SIG_MAX)
    return mean, log_std


if __name__ == "__main__":
    key = jax.random.PRNGKey(0)
    k_params, k_small, k_big = jax.random.split(key, 3)

    # StabilizerOneD-style small shapes.
    num_inputs, hidden_dim, num_actions = 4, 32, 2
    params = init_params(k_params, num_inputs, hidden_dim, num_actions)
    packed = pack_params(params)

    # 1) Small batch: single block.
    state = jax.random.normal(k_small, (8, num_inputs), jnp.float32)
    mean, log_std = jax.block_until_ready(gaussian_policy_forward(state, packed))
    ref_mean, ref_log_std = reference_forward(state, params)
    assert mean.shape == (8, num_actions)
    assert log_std.shape == (8, num_actions)
    assert jnp.allclose(mean, ref_mean, atol=1e-4, rtol=1e-4)
    assert jnp.allclose(log_std, ref_log_std, atol=1e-4, rtol=1e-4)

    # 2) Batch not divisible by the tile: exercises the pipelined multi-block
    #    grid (>=2 blocks -> both v7x TensorCores) and masked trailing stores.
    state_big = jax.random.normal(k_big, (600, num_inputs), jnp.float32)
    mean_b, log_std_b = jax.block_until_ready(
        gaussian_policy_forward(state_big, packed))
    ref_mean_b, ref_log_std_b = reference_forward(state_big, params)
    assert jnp.allclose(mean_b, ref_mean_b, atol=1e-4, rtol=1e-4)
    assert jnp.allclose(log_std_b, ref_log_std_b, atol=1e-4, rtol=1e-4)

    # TODO(synk): select_action's stochastic sampling (Normal.rsample / tanh
    # squash / log_prob) lives outside forward(); not implemented in-kernel.

    print("KERNEL_OK")
</pallas_src>

<mosaic_0001>
module attributes {stable_mosaic.version = 11 : i64} {
  func.func @gaussian_policy_kernel(%arg0: i32, %arg1: memref<8x4xf32, #tpu.memory_space<vmem>>, %arg2: memref<4x128xbf16, #tpu.memory_space<vmem>>, %arg3: memref<1x128xf32, #tpu.memory_space<vmem>>, %arg4: memref<128x128xbf16, #tpu.memory_space<vmem>>, %arg5: memref<1x128xf32, #tpu.memory_space<vmem>>, %arg6: memref<128x2xbf16, #tpu.memory_space<vmem>>, %arg7: memref<1x2xf32, #tpu.memory_space<vmem>>, %arg8: memref<128x2xbf16, #tpu.memory_space<vmem>>, %arg9: memref<1x2xf32, #tpu.memory_space<vmem>>, %arg10: memref<8x2xf32, #tpu.memory_space<vmem>>, %arg11: memref<8x2xf32, #tpu.memory_space<vmem>>) attributes {dimension_semantics = [#tpu.dimension_semantics<parallel>], iteration_bounds = array<i64: 1>, scalar_prefetch = 0 : i64, scratch_operands = 0 : i64, tpu.core_type = #tpu.core_type<tc>, window_params = [{transform_indices = @transform_0, window_bounds = array<i64: 8, 4>}, {pipeline_mode = #tpu.pipeline_mode<synchronous>, transform_indices = @transform_1, window_bounds = array<i64: 4, 128>}, {pipeline_mode = #tpu.pipeline_mode<synchronous>, transform_indices = @transform_2, window_bounds = array<i64: 1, 128>}, {pipeline_mode = #tpu.pipeline_mode<synchronous>, transform_indices = @transform_3, window_bounds = array<i64: 128, 128>}, {pipeline_mode = #tpu.pipeline_mode<synchronous>, transform_indices = @transform_4, window_bounds = array<i64: 1, 128>}, {pipeline_mode = #tpu.pipeline_mode<synchronous>, transform_indices = @transform_5, window_bounds = array<i64: 128, 2>}, {pipeline_mode = #tpu.pipeline_mode<synchronous>, transform_indices = @transform_6, window_bounds = array<i64: 1, 2>}, {pipeline_mode = #tpu.pipeline_mode<synchronous>, transform_indices = @transform_7, window_bounds = array<i64: 128, 2>}, {pipeline_mode = #tpu.pipeline_mode<synchronous>, transform_indices = @transform_8, window_bounds = array<i64: 1, 2>}, {transform_indices = @transform_9, window_bounds = array<i64: 8, 2>}, {transform_indices = @transform_10, window_bounds = array<i64: 8, 2>}]} {
    %c0 = arith.constant 0 : index
    %c0_0 = arith.constant 0 : index
    %0 = vector.load %arg1[%c0, %c0_0] : memref<8x4xf32, #tpu.memory_space<vmem>>, vector<8x4xf32>
    %1 = arith.truncf %0 : vector<8x4xf32> to vector<8x4xbf16>
    %c0_1 = arith.constant 0 : index
    %c0_2 = arith.constant 0 : index
    %2 = vector.load %arg2[%c0_1, %c0_2] : memref<4x128xbf16, #tpu.memory_space<vmem>>, vector<4x128xbf16>
    %cst = arith.constant dense<0.000000e+00> : vector<8x128xf32>
    %3 = tpu.matmul %1, %2, %cst {dimension_numbers = #tpu.dot_dimension_numbers<[1], [0], [0], [1], [0, 0, 1, 1], [], []>} : vector<8x4xbf16>, vector<4x128xbf16>, vector<8x128xf32> -> vector<8x128xf32>
    %c0_3 = arith.constant 0 : index
    %c0_4 = arith.constant 0 : index
    %4 = vector.load %arg3[%c0_3, %c0_4] : memref<1x128xf32, #tpu.memory_space<vmem>>, vector<1x128xf32>
    %5 = vector.broadcast %4 : vector<1x128xf32> to vector<8x128xf32>
    %6 = arith.addf %3, %5 : vector<8x128xf32>
    %cst_5 = arith.constant 0.000000e+00 : f32
    %7 = vector.broadcast %cst_5 : f32 to vector<8x128xf32>
    %8 = arith.maximumf %6, %7 : vector<8x128xf32>
    %9 = arith.truncf %8 : vector<8x128xf32> to vector<8x128xbf16>
    %c0_6 = arith.constant 0 : index
    %c0_7 = arith.constant 0 : index
    %10 = vector.load %arg4[%c0_6, %c0_7] : memref<128x128xbf16, #tpu.memory_space<vmem>>, vector<128x128xbf16>
    %cst_8 = arith.constant dense<0.000000e+00> : vector<8x128xf32>
    %11 = tpu.matmul %9, %10, %cst_8 {dimension_numbers = #tpu.dot_dimension_numbers<[1], [0], [0], [1], [0, 0, 1, 1], [], []>} : vector<8x128xbf16>, vector<128x128xbf16>, vector<8x128xf32> -> vector<8x128xf32>
    %c0_9 = arith.constant 0 : index
    %c0_10 = arith.constant 0 : index
    %12 = vector.load %arg5[%c0_9, %c0_10] : memref<1x128xf32, #tpu.memory_space<vmem>>, vector<1x128xf32>
    %13 = vector.broadcast %12 : vector<1x128xf32> to vector<8x128xf32>
    %14 = arith.addf %11, %13 : vector<8x128xf32>
    %cst_11 = arith.constant 0.000000e+00 : f32
    %15 = vector.broadcast %cst_11 : f32 to vector<8x128xf32>
    %16 = arith.maximumf %14, %15 : vector<8x128xf32>
    %17 = arith.truncf %16 : vector<8x128xf32> to vector<8x128xbf16>
    %c0_12 = arith.constant 0 : index
    %c0_13 = arith.constant 0 : index
    %18 = vector.load %arg6[%c0_12, %c0_13] : memref<128x2xbf16, #tpu.memory_space<vmem>>, vector<128x2xbf16>
    %cst_14 = arith.constant dense<0.000000e+00> : vector<8x2xf32>
    %19 = tpu.matmul %17, %18, %cst_14 {dimension_numbers = #tpu.dot_dimension_numbers<[1], [0], [0], [1], [0, 0, 1, 1], [], []>} : vector<8x128xbf16>, vector<128x2xbf16>, vector<8x2xf32> -> vector<8x2xf32>
    %c0_15 = arith.constant 0 : index
    %c0_16 = arith.constant 0 : index
    %20 = vector.load %arg7[%c0_15, %c0_16] : memref<1x2xf32, #tpu.memory_space<vmem>>, vector<1x2xf32>
    %21 = vector.broadcast %20 : vector<1x2xf32> to vector<8x2xf32>
    %22 = arith.addf %19, %21 : vector<8x2xf32>
    %c0_17 = arith.constant 0 : index
    %c0_18 = arith.constant 0 : index
    %23 = vector.load %arg8[%c0_17, %c0_18] : memref<128x2xbf16, #tpu.memory_space<vmem>>, vector<128x2xbf16>
    %cst_19 = arith.constant dense<0.000000e+00> : vector<8x2xf32>
    %24 = tpu.matmul %17, %23, %cst_19 {dimension_numbers = #tpu.dot_dimension_numbers<[1], [0], [0], [1], [0, 0, 1, 1], [], []>} : vector<8x128xbf16>, vector<128x2xbf16>, vector<8x2xf32> -> vector<8x2xf32>
    %c0_20 = arith.constant 0 : index
    %c0_21 = arith.constant 0 : index
    %25 = vector.load %arg9[%c0_20, %c0_21] : memref<1x2xf32, #tpu.memory_space<vmem>>, vector<1x2xf32>
    %26 = vector.broadcast %25 : vector<1x2xf32> to vector<8x2xf32>
    %27 = arith.addf %24, %26 : vector<8x2xf32>
    %cst_22 = arith.constant -2.000000e+01 : f32
    %cst_23 = arith.constant 1.000000e+00 : f32
    %28 = vector.broadcast %cst_22 : f32 to vector<8x2xf32>
    %29 = arith.maximumf %28, %27 : vector<8x2xf32>
    %30 = vector.broadcast %cst_23 : f32 to vector<8x2xf32>
    %31 = arith.minimumf %30, %29 : vector<8x2xf32>
    %c0_24 = arith.constant 0 : index
    %c0_25 = arith.constant 0 : index
    %32 = vector.load %arg10[%c0_24, %c0_25] : memref<8x2xf32, #tpu.memory_space<vmem>>, vector<8x2xf32>
    tpu.vector_store %arg10[%c0_24, %c0_25], %22 {strides = array<i32>} : memref<8x2xf32, #tpu.memory_space<vmem>>, vector<8x2xf32>,
    %c0_26 = arith.constant 0 : index
    %c0_27 = arith.constant 0 : index
    %33 = vector.load %arg11[%c0_26, %c0_27] : memref<8x2xf32, #tpu.memory_space<vmem>>, vector<8x2xf32>
    tpu.vector_store %arg11[%c0_26, %c0_27], %31 {strides = array<i32>} : memref<8x2xf32, #tpu.memory_space<vmem>>, vector<8x2xf32>,
    return
  }
  func.func @transform_0(%arg0: i32) -> (i32, i32) {
    %c0_i32 = arith.constant 0 : i32
    %c0_i32_0 = arith.constant 0 : i32
    return %arg0, %c0_i32 : i32, i32
  }
  func.func @transform_1(%arg0: i32) -> (i32, i32) {
    %c0_i32 = arith.constant 0 : i32
    %c0_i32_0 = arith.constant 0 : i32
    %c0_i32_1 = arith.constant 0 : i32
    return %c0_i32, %c0_i32_0 : i32, i32
  }
  func.func @transform_2(%arg0: i32) -> (i32, i32) {
    %c0_i32 = arith.constant 0 : i32
    %c0_i32_0 = arith.constant 0 : i32
    %c0_i32_1 = arith.constant 0 : i32
    return %c0_i32, %c0_i32_0 : i32, i32
  }
  func.func @transform_3(%arg0: i32) -> (i32, i32) {
    %c0_i32 = arith.constant 0 : i32
    %c0_i32_0 = arith.constant 0 : i32
    %c0_i32_1 = arith.constant 0 : i32
    return %c0_i32, %c0_i32_0 : i32, i32
  }
  func.func @transform_4(%arg0: i32) -> (i32, i32) {
    %c0_i32 = arith.constant 0 : i32
    %c0_i32_0 = arith.constant 0 : i32
    %c0_i32_1 = arith.constant 0 : i32
    return %c0_i32, %c0_i32_0 : i32, i32
  }
  func.func @transform_5(%arg0: i32) -> (i32, i32) {
    %c0_i32 = arith.constant 0 : i32
    %c0_i32_0 = arith.constant 0 : i32
    %c0_i32_1 = arith.constant 0 : i32
    return %c0_i32, %c0_i32_0 : i32, i32
  }
  func.func @transform_6(%arg0: i32) -> (i32, i32) {
    %c0_i32 = arith.constant 0 : i32
    %c0_i32_0 = arith.constant 0 : i32
    %c0_i32_1 = arith.constant 0 : i32
    return %c0_i32, %c0_i32_0 : i32, i32
  }
  func.func @transform_7(%arg0: i32) -> (i32, i32) {
    %c0_i32 = arith.constant 0 : i32
    %c0_i32_0 = arith.constant 0 : i32
    %c0_i32_1 = arith.constant 0 : i32
    return %c0_i32, %c0_i32_0 : i32, i32
  }
  func.func @transform_8(%arg0: i32) -> (i32, i32) {
    %c0_i32 = arith.constant 0 : i32
    %c0_i32_0 = arith.constant 0 : i32
    %c0_i32_1 = arith.constant 0 : i32
    return %c0_i32, %c0_i32_0 : i32, i32
  }
  func.func @transform_9(%arg0: i32) -> (i32, i32) {
    %c0_i32 = arith.constant 0 : i32
    %c0_i32_0 = arith.constant 0 : i32
    return %arg0, %c0_i32 : i32, i32
  }
  func.func @transform_10(%arg0: i32) -> (i32, i32) {
    %c0_i32 = arith.constant 0 : i32
    %c0_i32_0 = arith.constant 0 : i32
    return %arg0, %c0_i32 : i32, i32
  }
}

</mosaic_0001>

<bundles_post_ra>
// kernel: tpu_custom_call.1
= control target key start
LH: loop header
LB: loop body
LE: loop exit
PB: predicated region body
PF: predicated region fallthrough
CT: control target
= control target key end

     0   :  { %vm49_vm0 = vcmask 1041408   ;;  %v593_v0 = vmov 0.0   ;;  %vm594_vm1 = vmmov 0   ;;  %vm45_vm2 = vcmask 31744   ;;  %s779_s1 = inlined_call_operand.vmem [shape: bf16[4,128], index: 1, kind: input, shape index: {}]   ;;  %s780_s0 = inlined_call_operand.vmem [shape: f32[8,4], index: 0, kind: input, shape index: {}]   ;;  %s781_s3 = inlined_call_operand.vmem [shape: bf16[128,128], index: 3, kind: input, shape index: {}]   ;;  %s782_s5 = inlined_call_operand.vmem [shape: bf16[128,2], index: 5, kind: input, shape index: {}]   ;;  %s783_s7 = inlined_call_operand.vmem [shape: bf16[128,2], index: 7, kind: input, shape index: {}]   ;;  %s784_s2 = inlined_call_operand.vmem [shape: f32[1,128], index: 2, kind: input, shape index: {}]   ;;  %s785_s4 = inlined_call_operand.vmem [shape: f32[1,128], index: 4, kind: input, shape index: {}]   ;;  %s786_s6 = inlined_call_operand.vmem [shape: f32[1,2], index: 6, kind: input, shape index: {}]   ;;  %s787_s8 = inlined_call_operand.vmem [shape: f32[1,2], index: 8, kind: input, shape index: {}]   ;;  %s788_s9 = inlined_call_operand.vmem [shape: f32[8,2], index: 9, kind: output, shape index: {0}]   ;;  %s789_s10 = inlined_call_operand.vmem [shape: f32[8,2], index: 10, kind: output, shape index: {1}]  }
   0x1   :  { %501 = vmatprep.subr.bf16.mxu0 %v593_v0  ;;  %v37_v1 = vld [vmem:[%s779_s1] sm:$0x3]  ;;  %503 = vmatprep.mubr.msk.bf16.mxu0 %vm594_vm1, %v593_v0  ;;  %v569_v5 = vld [vmem:[%s781_s3 + $0x38] sm:$0xff]   ;;  %v570_v6 = vld [vmem:[%s781_s3 + $0x30] sm:$0xff]   ;;  %vm432_vm3 = vcmask 15360  }
   0x2   :  { %v35_v2 = vld [vmem:[%s780_s0] sm:$0xff]  ;;  %v51_v3 = vsel %vm49_vm0, %v37_v1, 0  ;;  %507 = vmatprep.subr.bf16.mxu1 %v593_v0  ;;  %523 = vmatprep.mubr.msk.bf16.mxu1 %vm594_vm1, %v593_v0  ;;  %v571_v7 = vld [vmem:[%s781_s3 + $0x28] sm:$0xff]   ;;  %v573_v9 = vld [vmem:[%s781_s3 + $0x18] sm:$0xff]  }
   0x3   :  { %v36_v4 = vpack.c.bf16 %v35_v2, %v35_v2  ;;  %502 = vmatpush3.bf16.msra.mxu0 %v51_v3  ;;  %508 = vmatpush3.bf16.msra.mxu1 %v569_v5  ;;  %v572_v8 = vld [vmem:[%s781_s3 + $0x20] sm:$0xff]   ;;  %v574_v10 = vld [vmem:[%s781_s3 + $0x10] sm:$0xff]   ;;  %v575_v11 = vld [vmem:[%s781_s3 + $0x8] sm:$0xff]  }
   0x4   :  { %527 = vmatprep.subr.bf16.mxu0 %v593_v0  ;;  %509 = vmatprep.subr.bf16.mxu1 %v593_v0  ;;  %v576_v12 = vld [vmem:[%s781_s3] sm:$0xff]   ;;  %v577_v13 = vld [vmem:[%s782_s5 + $0x38] sm:$0xff]   ;;  %v579_v14 = vld [vmem:[%s782_s5 + $0x30] sm:$0xff]  }
   0x5   :  { %v581_v15 = vld [vmem:[%s782_s5 + $0x28] sm:$0xff]   ;;  %v583_v16 = vld [vmem:[%s782_s5 + $0x20] sm:$0xff]   ;;  %v585_v17 = vld [vmem:[%s782_s5 + $0x18] sm:$0xff]  }
   0x6   :  { %504 = vmatmul.mubr.msk.bf16.vlgmr.msra.gmra.mxu0 %vm45_vm2, %v36_v4  ;;  %v587_v18 = vld [vmem:[%s782_s5 + $0x10] sm:$0xff]   ;;  %v443_v19 = vld [vmem:[%s784_s2] ss:$0 sm:$0xff]  ;;  %v578_v25 = vld [vmem:[%s783_s7 + $0x38] sm:$0xff]  }
   0x7   :  { %543 = vmatprep.mubr.msk.bf16.mxu0 %vm594_vm1, %v593_v0  ;;  %510 = vmatpush3.bf16.msra.mxu1 %v570_v6  ;;  %v580_v28 = vld [vmem:[%s783_s7 + $0x30] sm:$0xff]   ;;  %v582_v29 = vld [vmem:[%s783_s7 + $0x28] sm:$0xff]   ;;  %v584_v30 = vld [vmem:[%s783_s7 + $0x20] sm:$0xff]  }
   0x8   :  { %511 = vmatprep.subr.bf16.mxu1 %v593_v0  ;;  %528 = vmatpush3.bf16.msra.mxu0 %v577_v13  ;;  %v586_v31 = vld [vmem:[%s783_s7 + $0x18] sm:$0xff]   ;;  %v588_v32 = vld [vmem:[%s783_s7 + $0x10] sm:$0xff]   ;;  %v589_v33 = vld [vmem:[%s782_s5 + $0x8] sm:$0xff]  }
   0x9   :  { %529 = vmatprep.subr.bf16.mxu0 %v593_v0  ;;  %v590_v34 = vld [vmem:[%s783_s7 + $0x8] sm:$0xff]   ;;  %v591_v35 = vld [vmem:[%s782_s5] sm:$0xff]  }
   0xa   :  { %v592_v36 = vld [vmem:[%s783_s7] sm:$0xff]  }
   0xb   :  { %512 = vmatpush3.bf16.msra.mxu1 %v571_v7  ;;  %v445_v37 = vld [vmem:[%s785_s4] ss:$0 sm:$0xff] }
   0xc   :  { %513 = vmatprep.subr.bf16.mxu1 %v593_v0  ;;  %530 = vmatpush3.bf16.msra.mxu0 %v579_v14  ;;  %v454_v45 = vld [vmem:[%s786_s6] ss:$0 sm:$0xff] }
   0xd   :  { %531 = vmatprep.subr.bf16.mxu0 %v593_v0  ;;  %v463_v46 = vld [vmem:[%s787_s8] ss:$0 sm:$0xff] }
   0xf   :  { %514 = vmatpush3.bf16.msra.mxu1 %v572_v8 }
  0x10   :  { %515 = vmatprep.subr.bf16.mxu1 %v593_v0  ;;  %532 = vmatpush3.bf16.msra.mxu0 %v581_v15 }
  0x11   :  { %533 = vmatprep.subr.bf16.mxu0 %v593_v0 }
  0x13   :  { %516 = vmatpush3.bf16.msra.mxu1 %v573_v9 }
  0x14   :  { %517 = vmatprep.subr.bf16.mxu1 %v593_v0  ;;  %534 = vmatpush3.bf16.msra.mxu0 %v583_v16 }
  0x15   :  { %535 = vmatprep.subr.bf16.mxu0 %v593_v0 }
  0x17   :  { %518 = vmatpush3.bf16.msra.mxu1 %v574_v10 }
  0x18   :  { %519 = vmatprep.subr.bf16.mxu1 %v593_v0  ;;  %536 = vmatpush3.bf16.msra.mxu0 %v585_v17 }
  0x19   :  { %537 = vmatprep.subr.bf16.mxu0 %v593_v0 }
  0x1b   :  { %520 = vmatpush3.bf16.msra.mxu1 %v575_v11 }
  0x1c   :  { %521 = vmatprep.subr.bf16.mxu1 %v593_v0  ;;  %538 = vmatpush3.bf16.msra.mxu0 %v587_v18 }
  0x1d   :  { %539 = vmatprep.subr.bf16.mxu0 %v593_v0 }
  0x1f   :  { %522 = vmatpush3.bf16.msra.mxu1 %v576_v12 }
  0x20   :  { %547 = vmatprep.subr.bf16.mxu1 %v593_v0  ;;  %540 = vmatpush3.bf16.msra.mxu0 %v589_v33 }
  0x21   :  { %541 = vmatprep.subr.bf16.mxu0 %v593_v0 }
  0x24   :  { %542 = vmatpush3.bf16.msra.mxu0 %v591_v35 }
  0xc6   :  { %v87_v20 = vpop.f32.mrf.mxu0 }
  0xc7   :  { %v88_v21 = vadd.f32 %v443_v19, %v87_v20 }
  0xc8   :  { %v505_v22 = vpop.f32.mrf.mxu0 }
  0xc9   :  { %v93_v23 = vmax.f32 %v88_v21, 0.0 }
  0xca   :  { %v90_v24 = vpop.f32.mrf.mxu0 }
  0xcb   :  { %v94_v26 = vpack.c.bf16 %v93_v23, %v93_v23 }
  0xcc   :  { %v506_v27 = vpop.f32.mrf.mxu0 }
  0xcd   :  { %524 = vmatmul.mubr.bf16.vlgmr.msra.gmra.mxu1 %v94_v26 }
  0xce   :  { %548 = vmatpush3.bf16.msra.mxu1 %v578_v25  ;;  %563 = vmatprep.mubr.msk.bf16.mxu1 %vm594_vm1, %v593_v0 }
  0xcf   :  { %549 = vmatprep.subr.bf16.mxu1 %v593_v0 }
  0xd2   :  { %550 = vmatpush3.bf16.msra.mxu1 %v580_v28 }
  0xd3   :  { %551 = vmatprep.subr.bf16.mxu1 %v593_v0 }
  0xd6   :  { %552 = vmatpush3.bf16.msra.mxu1 %v582_v29 }
  0xd7   :  { %553 = vmatprep.subr.bf16.mxu1 %v593_v0 }
  0xda   :  { %554 = vmatpush3.bf16.msra.mxu1 %v584_v30 }
  0xdb   :  { %555 = vmatprep.subr.bf16.mxu1 %v593_v0 }
  0xde   :  { %556 = vmatpush3.bf16.msra.mxu1 %v586_v31 }
  0xdf   :  { %557 = vmatprep.subr.bf16.mxu1 %v593_v0 }
  0xe2   :  { %558 = vmatpush3.bf16.msra.mxu1 %v588_v32 }
  0xe3   :  { %559 = vmatprep.subr.bf16.mxu1 %v593_v0 }
  0xe6   :  { %560 = vmatpush3.bf16.msra.mxu1 %v590_v34 }
  0xe7   :  { %561 = vmatprep.subr.bf16.mxu1 %v593_v0 }
  0xea   :  { %562 = vmatpush3.bf16.msra.mxu1 %v592_v36 }
 0x18d   :  { %v200_v38 = vpop.f32.mrf.mxu1 }
 0x18e   :  { %v201_v39 = vadd.f32 %v445_v37, %v200_v38 }
 0x18f   :  { %v525_v40 = vpop.f32.mrf.mxu1 }
 0x190   :  { %v206_v41 = vmax.f32 %v201_v39, 0.0 }
 0x191   :  { %v203_v42 = vpop.f32.mrf.mxu1 }
 0x192   :  { %v207_v43 = vpack.c.bf16 %v206_v41, %v206_v41 }
 0x193   :  { %v526_v44 = vpop.f32.mrf.mxu1 }
 0x194   :  { %544 = vmatmul.mubr.bf16.vlgmr.msra.gmra.mxu0 %v207_v43  ;;  %564 = vmatmul.mubr.bf16.vlgmr.msra.gmra.mxu1 %v207_v43 }
 0x254   :  { %v313_v47 = vpop.f32.mrf.mxu0  ;;  %v424_v48 = vpop.f32.mrf.mxu1 }
 0x255   :  { %v314_v49 = vadd.f32 %v454_v45, %v313_v47  ;;  %v425_v50 = vadd.f32 %v463_v46, %v424_v48 }
 0x256   :  { %v545_v51 = vpop.f32.mrf.mxu0  ;;  %v565_v52 = vpop.f32.mrf.mxu1 }
 0x257   :  { %433 = vst.msk [vmem:[%s788_s9] sm:$0xff] %vm432_vm3, %v314_v49  ;;  %v430_v53 = vmax.f32 %v425_v50, -20.0 }
 0x258   :  { %v316_v54 = vpop.f32.mrf.mxu0  ;;  %v427_v55 = vpop.f32.mrf.mxu1 }
 0x259   :  { %v431_v56 = vmin.f32 %v430_v53, 1.0 }
 0x25a   :  { %v546_v57 = vpop.f32.mrf.mxu0  ;;  %v566_v58 = vpop.f32.mrf.mxu1 }
 0x25b   :  { %434 = vst.msk [vmem:[%s789_s10] sm:$0xff] %vm432_vm3, %v431_v56 }

</bundles_post_ra>
